<compile_context>
chip_gen: v7x
topology: tpu7x:2x2x1
jax: 0.10.0
libtpu: 0.0.40
codegen_flags: <defaults>
</compile_context>

<pallas_src>
import jax
import jax.numpy as jnp
from jax import lax
from jax.experimental import pallas as pl
from jax.experimental.pallas import tpu as pltpu

_LANES = 128
_SUBLANES = 8
_CHUNK_ROWS = 256          # rows per fused accumulation chunk inside a block


def _round_up(x, m):
    return (x + m - 1) // m * m


def _device_tiling():
    """(max bytes per input block, vmem_limit_bytes or None) per TPU generation."""
    kind = ""
    try:
        kind = jax.devices()[0].device_kind.lower()
    except Exception:
        pass
    vmem_cap = None
    try:
        vmem_cap = getattr(pltpu.get_tpu_info(), "vmem_capacity_bytes", None)
    except Exception:
        pass
    if (vmem_cap is not None and vmem_cap <= 64 * 2**20) or "v7" in kind or "7x" in kind:
        # v7x: ~3.2 TB/s HBM -> big blocks amortize the ~0.35us/step overhead;
        # 3 inputs x 2 buffers x 4 MiB = 24 MiB, raise scoped VMEM explicitly.
        return 4 * 2**20, 40 * 2**20
    if "v2" in kind or "v3" in kind or "v4" in kind or "v5" in kind:
        # v5e and older: stay under the 16 MiB default scoped VMEM (3x2x1 = 6 MiB).
        return 1 * 2**20, None
    # v6e / unknown: 3 x 2 x 2 MiB = 12 MiB double-buffered, under a 32 MiB limit.
    return 2 * 2**20, 32 * 2**20


def _make_kernel(valid_rows, need_mask, has_tn):
    """Streaming reduction kernel; config (row extent, masking, #inputs) is static."""

    def kernel(*refs):
        if has_tn:
            o_ref, tgt_ref, tn_ref, s_ref, num_ref = refs
        else:
            o_ref, tgt_ref, s_ref, num_ref = refs
            tn_ref = None

        r = pl.program_id(2)

        @pl.when(r == 0)
        def _init():
            s_ref[...] = jnp.zeros_like(s_ref)
            num_ref[...] = jnp.zeros_like(num_ref)

        br, ccols = o_ref.shape[1], o_ref.shape[2]
        # Global row index of this block's first row (P-split aware).
        block_row0 = (pl.program_id(1) * pl.num_programs(2) + r) * br

        def accum(start, nrows):
            # Fused single pass: every input vreg of this chunk is loaded once and
            # both partial sums are updated; no block-sized temporaries linger.
            o = o_ref[0, pl.ds(start, nrows), :].astype(jnp.float32)
            tgt = jnp.abs(tgt_ref[0, pl.ds(start, nrows), :].astype(jnp.float32))
            if has_tn:
                diff = jnp.abs(tn_ref[0, pl.ds(start, nrows), :].astype(jnp.float32)) - tgt
            else:
                diff = -tgt                      # |0| - |target|
            s_c = jnp.abs(o)
            n_c = o * diff
            if need_mask:
                # Rows past the logical extent hold unspecified data -> zero BOTH
                # contributions (jnp.where also squashes NaN/Inf garbage).
                row = (block_row0 + start
                       + lax.broadcasted_iota(jnp.int32, (nrows, ccols), 0))
                keep = row < valid_rows
                s_c = jnp.where(keep, s_c, 0.0)
                n_c = jnp.where(keep, n_c, 0.0)
            full = (nrows // _SUBLANES) * _SUBLANES
            if full:
                k = full // _SUBLANES
                s_ref[0, 0] += s_c[:full].reshape(k, _SUBLANES, ccols).sum(axis=0)
                num_ref[0, 0] += n_c[:full].reshape(k, _SUBLANES, ccols).sum(axis=0)
            tail = nrows - full                 # ragged sublane tail (< 8 rows)
            if tail:
                s_ref[0, 0, 0:tail, :] += s_c[full:, :]
                num_ref[0, 0, 0:tail, :] += n_c[full:, :]

        chunk = min(_CHUNK_ROWS, br)
        n_full = br // chunk
        rem = br - n_full * chunk
        if n_full == 1:
            accum(0, chunk)
        else:
            @pl.loop(0, n_full)
            def _chunk_loop(i):
                accum(pl.multiple_of(i * chunk, chunk), chunk)
        if rem:
            accum(n_full * chunk, rem)

    return kernel


def stock_loss(nn_output, target, target_next=None, *, extra_node=False,
               max_block_bytes=None, vmem_limit_bytes=None):
    """Pallas TPU equivalent of DeformTime stock_loss.forward (extra_node=False)."""
    if extra_node:
        # TODO(synk): extra_node=True (drop last asset column + hold_cap sum) not implemented.
        raise NotImplementedError("extra_node=True path is not implemented")

    B, T, N = nn_output.shape
    L = T * N
    has_tn = target_next is not None

    # ---- copy-free view: lane-dense if possible, natural layout otherwise ----
    if L % _LANES == 0:
        R, C = L // _LANES, _LANES

        def view(x):
            return x.reshape(B, R, C)       # contiguous reshape: no data movement
    else:
        R, C = T, N

        def view(x):
            return x                        # natural (B, T, N): no pad, no copy

    operands = (view(nn_output), view(target)) + ((view(target_next),) if has_tn else ())
    num_inputs = len(operands)
    itemsize = jnp.dtype(nn_output.dtype).itemsize

    # ---- generation-dependent block sizing ----
    dflt_block, dflt_vmem = _device_tiling()
    if max_block_bytes is None:
        max_block_bytes = dflt_block
    if vmem_limit_bytes is None:
        vmem_limit_bytes = dflt_vmem

    bytes_per_row = _round_up(C, _LANES) * max(itemsize, 4)   # VMEM lane padding
    br_cap = max(_SUBLANES,
                 (max_block_bytes // bytes_per_row) // _SUBLANES * _SUBLANES)
    if R <= br_cap:
        br, n_rblocks = R, 1                # single block == full row extent (always legal)
    else:
        br, n_rblocks = br_cap, pl.cdiv(R, br_cap)

    # 2-way split of the row axis so both v7x TensorCores are busy when B == 1.
    P = 1
    if B == 1 and n_rblocks >= 2 and n_rblocks % 2 == 0:
        P, n_rblocks = 2, n_rblocks // 2

    need_mask = P * n_rblocks * br > R
    kernel = _make_kernel(R, need_mask, has_tn)

    n_r = n_rblocks
    in_specs = [
        pl.BlockSpec((1, br, C), lambda b, p, r: (b, p * n_r + r, 0))
        for _ in operands
    ]
    out_specs = [
        pl.BlockSpec((1, 1, _SUBLANES, C), lambda b, p, r: (b, p, 0, 0))
        for _ in range(2)
    ]
    out_shape = tuple(
        jax.ShapeDtypeStruct((B, P, _SUBLANES, C), jnp.float32) for _ in range(2)
    )

    cost = pl.CostEstimate(
        flops=6 * B * L,
        transcendentals=0,
        bytes_accessed=num_inputs * B * L * itemsize + 2 * B * P * _SUBLANES * C * 4,
    )

    s_tiles, num_tiles = pl.pallas_call(
        kernel,
        out_shape=out_shape,
        grid_spec=pltpu.PrefetchScalarGridSpec(
            num_scalar_prefetch=0,
            grid=(B, P, n_rblocks),          # reduction (row blocks) is innermost
            in_specs=in_specs,
            out_specs=out_specs,
        ),
        compiler_params=pltpu.CompilerParams(
            dimension_semantics=("parallel", "parallel", "arbitrary"),
            vmem_limit_bytes=vmem_limit_bytes),
        cost_estimate=cost,
    )(*operands)

    s = jnp.sum(s_tiles, axis=(1, 2, 3))      # (B,)  sum(|nn_output[b]|)
    num = jnp.sum(num_tiles, axis=(1, 2, 3))  # (B,)  sum(nn_output[b] * diff[b])
    # extra_node=False -> hold_cap term contributes 0.
    return -jnp.sum(num / s)


def _reference(nn_output, target, target_next=None):
    if target_next is None:
        target_next = jnp.zeros_like(target)
    abs_o = jnp.abs(nn_output)
    signs = nn_output / abs_o
    s = jnp.sum(abs_o, axis=(1, 2))
    v = abs_o / s[:, None, None]
    diff = jnp.abs(target_next) - jnp.abs(target)
    return -jnp.sum(v * diff * signs)


def _check(name, B, T, N, with_tn, key, **overrides):
    k1, k2, k3 = jax.random.split(key, 3)
    o = jax.random.normal(k1, (B, T, N), dtype=jnp.float32)
    tgt = jax.random.normal(k2, (B, T, N), dtype=jnp.float32)
    tn = jax.random.normal(k3, (B, T, N), dtype=jnp.float32) if with_tn else None
    loss = jax.block_until_ready(stock_loss(o, tgt, tn, **overrides))
    ref = _reference(o, tgt, tn)
    assert bool(jnp.isfinite(loss)), (name, loss)
    assert jnp.allclose(loss, ref, rtol=5e-4, atol=1e-5), (name, loss, ref)


if __name__ == "__main__":
    key = jax.random.PRNGKey(0)
    keys = jax.random.split(key, 6)
    # 1. lane-dense view (T*N % 128 == 0), tiny single block, both kernel variants.
    _check("dense_no_tn", 2, 8, 16, False, keys[0])
    _check("dense_tn", 2, 8, 16, True, keys[1])
    # 2. natural (B, T, N) layout (T*N % 128 != 0): ragged sublane tail, no padding.
    _check("natural_tail", 2, 13, 7, True, keys[2])
    # 3. multi-block streaming reduction with in-kernel row masking.
    _check("natural_masked_blocks", 2, 50, 7, False, keys[3], max_block_bytes=4096)
    # 4. B == 1: 2-way parallel split of the row axis (v7x dual-TensorCore path).
    _check("split_rows_b1", 1, 256, 16, True, keys[4], max_block_bytes=4096)
    # 5. chunked pl.loop path inside a large single block.
    _check("chunk_loop", 2, 520, 128, True, keys[5])
    print("KERNEL_OK")
</pallas_src>

<mosaic_0001>
module attributes {stable_mosaic.version = 11 : i64} {
  func.func @kernel(%arg0: i32, %arg1: i32, %arg2: i32, %arg3: memref<1x1x128xf32, #tpu.memory_space<vmem>>, %arg4: memref<1x1x128xf32, #tpu.memory_space<vmem>>, %arg5: memref<1x1x8x128xf32, #tpu.memory_space<vmem>>, %arg6: memref<1x1x8x128xf32, #tpu.memory_space<vmem>>) attributes {dimension_semantics = [#tpu.dimension_semantics<parallel>, #tpu.dimension_semantics<parallel>, #tpu.dimension_semantics<arbitrary>], iteration_bounds = array<i64: 2, 1, 1>, scalar_prefetch = 0 : i64, scratch_operands = 0 : i64, tpu.core_type = #tpu.core_type<tc>, window_params = [{transform_indices = @transform_0, window_bounds = array<i64: 1, 1, 128>}, {transform_indices = @transform_1, window_bounds = array<i64: 1, 1, 128>}, {transform_indices = @transform_2, window_bounds = array<i64: 1, 1, 8, 128>}, {transform_indices = @transform_3, window_bounds = array<i64: 1, 1, 8, 128>}]} {
    %c0_i32 = arith.constant 0 : i32
    %0 = arith.cmpi eq, %arg2, %c0_i32 : i32
    %1 = arith.extui %0 : i1 to i32
    %c0_i32_0 = arith.constant 0 : i32
    %2 = arith.cmpi ne, %1, %c0_i32_0 : i32
    scf.if %2 {
      %cst_22 = arith.constant 0.000000e+00 : f32
      %24 = vector.broadcast %cst_22 : f32 to vector<1x1x8x128xf32>
      %c0_23 = arith.constant 0 : index
      %c0_24 = arith.constant 0 : index
      %c0_25 = arith.constant 0 : index
      %c0_26 = arith.constant 0 : index
      %25 = vector.load %arg5[%c0_23, %c0_24, %c0_25, %c0_26] : memref<1x1x8x128xf32, #tpu.memory_space<vmem>>, vector<1x1x8x128xf32>
      tpu.vector_store %arg5[%c0_23, %c0_24, %c0_25, %c0_26], %24 {strides = array<i32>} : memref<1x1x8x128xf32, #tpu.memory_space<vmem>>, vector<1x1x8x128xf32>,
      %cst_27 = arith.constant 0.000000e+00 : f32
      %26 = vector.broadcast %cst_27 : f32 to vector<1x1x8x128xf32>
      %c0_28 = arith.constant 0 : index
      %c0_29 = arith.constant 0 : index
      %c0_30 = arith.constant 0 : index
      %c0_31 = arith.constant 0 : index
      %27 = vector.load %arg6[%c0_28, %c0_29, %c0_30, %c0_31] : memref<1x1x8x128xf32, #tpu.memory_space<vmem>>, vector<1x1x8x128xf32>
      tpu.vector_store %arg6[%c0_28, %c0_29, %c0_30, %c0_31], %26 {strides = array<i32>} : memref<1x1x8x128xf32, #tpu.memory_space<vmem>>, vector<1x1x8x128xf32>,
    } else {
    }
    %c0 = arith.constant 0 : index
    %c0_1 = arith.constant 0 : index
    %c0_2 = arith.constant 0 : index
    %3 = vector.load %arg3[%c0, %c0_1, %c0_2] : memref<1x1x128xf32, #tpu.memory_space<vmem>>, vector<1x1x128xf32>
    %4 = vector.shape_cast %3 : vector<1x1x128xf32> to vector<1x128xf32>
    %c0_3 = arith.constant 0 : index
    %c0_4 = arith.constant 0 : index
    %c0_5 = arith.constant 0 : index
    %5 = vector.load %arg4[%c0_3, %c0_4, %c0_5] : memref<1x1x128xf32, #tpu.memory_space<vmem>>, vector<1x1x128xf32>
    %6 = vector.shape_cast %5 : vector<1x1x128xf32> to vector<1x128xf32>
    %7 = math.absf %6 : vector<1x128xf32>
    %cst = arith.constant 0.000000e+00 : f32
    %8 = vector.broadcast %cst : f32 to vector<1x128xf32>
    %9 = arith.subf %8, %7 : vector<1x128xf32>
    %10 = math.absf %4 : vector<1x128xf32>
    %11 = arith.mulf %4, %9 : vector<1x128xf32>
    %c0_6 = arith.constant 0 : index
    %c0_7 = arith.constant 0 : index
    %c0_8 = arith.constant 0 : index
    %c0_9 = arith.constant 0 : index
    %12 = vector.load %arg5[%c0_6, %c0_7, %c0_8, %c0_9] : memref<1x1x8x128xf32, #tpu.memory_space<vmem>>, vector<1x1x1x128xf32>
    %13 = vector.shape_cast %12 : vector<1x1x1x128xf32> to vector<1x128xf32>
    %14 = arith.addf %13, %10 : vector<1x128xf32>
    %c0_10 = arith.constant 0 : index
    %c0_11 = arith.constant 0 : index
    %c0_12 = arith.constant 0 : index
    %c0_13 = arith.constant 0 : index
    %15 = vector.load %arg5[%c0_10, %c0_11, %c0_12, %c0_13] : memref<1x1x8x128xf32, #tpu.memory_space<vmem>>, vector<1x1x1x128xf32>
    %16 = vector.shape_cast %15 : vector<1x1x1x128xf32> to vector<1x128xf32>
    %17 = vector.shape_cast %14 : vector<1x128xf32> to vector<1x1x1x128xf32>
    tpu.vector_store %arg5[%c0_10, %c0_11, %c0_12, %c0_13], %17 {strides = array<i32>} : memref<1x1x8x128xf32, #tpu.memory_space<vmem>>, vector<1x1x1x128xf32>,
    %c0_14 = arith.constant 0 : index
    %c0_15 = arith.constant 0 : index
    %c0_16 = arith.constant 0 : index
    %c0_17 = arith.constant 0 : index
    %18 = vector.load %arg6[%c0_14, %c0_15, %c0_16, %c0_17] : memref<1x1x8x128xf32, #tpu.memory_space<vmem>>, vector<1x1x1x128xf32>
    %19 = vector.shape_cast %18 : vector<1x1x1x128xf32> to vector<1x128xf32>
    %20 = arith.addf %19, %11 : vector<1x128xf32>
    %c0_18 = arith.constant 0 : index
    %c0_19 = arith.constant 0 : index
    %c0_20 = arith.constant 0 : index
    %c0_21 = arith.constant 0 : index
    %21 = vector.load %arg6[%c0_18, %c0_19, %c0_20, %c0_21] : memref<1x1x8x128xf32, #tpu.memory_space<vmem>>, vector<1x1x1x128xf32>
    %22 = vector.shape_cast %21 : vector<1x1x1x128xf32> to vector<1x128xf32>
    %23 = vector.shape_cast %20 : vector<1x128xf32> to vector<1x1x1x128xf32>
    tpu.vector_store %arg6[%c0_18, %c0_19, %c0_20, %c0_21], %23 {strides = array<i32>} : memref<1x1x8x128xf32, #tpu.memory_space<vmem>>, vector<1x1x1x128xf32>,
    return
  }
  func.func @transform_0(%arg0: i32, %arg1: i32, %arg2: i32) -> (i32, i32, i32) {
    %c1_i32 = arith.constant 1 : i32
    %0 = arith.muli %arg1, %c1_i32 : i32
    %1 = arith.addi %0, %arg2 : i32
    %c0_i32 = arith.constant 0 : i32
    %c0_i32_0 = arith.constant 0 : i32
    return %arg0, %1, %c0_i32 : i32, i32, i32
  }
  func.func @transform_1(%arg0: i32, %arg1: i32, %arg2: i32) -> (i32, i32, i32) {
    %c1_i32 = arith.constant 1 : i32
    %0 = arith.muli %arg1, %c1_i32 : i32
    %1 = arith.addi %0, %arg2 : i32
    %c0_i32 = arith.constant 0 : i32
    %c0_i32_0 = arith.constant 0 : i32
    return %arg0, %1, %c0_i32 : i32, i32, i32
  }
  func.func @transform_2(%arg0: i32, %arg1: i32, %arg2: i32) -> (i32, i32, i32, i32) {
    %c0_i32 = arith.constant 0 : i32
    %c0_i32_0 = arith.constant 0 : i32
    %c0_i32_1 = arith.constant 0 : i32
    return %arg0, %arg1, %c0_i32, %c0_i32_0 : i32, i32, i32, i32
  }
  func.func @transform_3(%arg0: i32, %arg1: i32, %arg2: i32) -> (i32, i32, i32, i32) {
    %c0_i32 = arith.constant 0 : i32
    %c0_i32_0 = arith.constant 0 : i32
    %c0_i32_1 = arith.constant 0 : i32
    return %arg0, %arg1, %c0_i32, %c0_i32_0 : i32, i32, i32, i32
  }
}

</mosaic_0001>

<bundles_post_ra>
// kernel: tpu_custom_call.1
= control target key start
LH: loop header
LB: loop body
LE: loop exit
PB: predicated region body
PF: predicated region fallthrough
CT: control target
= control target key end

     0   :  { %9 = vsyncpa [#allocation3], 0  ;;  %s903_s0 = inlined_call_operand.hbm [shape: f32[2,1,128], index: 0, kind: input, shape index: {}]   ;;  %s904_s1 = inlined_call_operand.vmem [shape: f32[2,1,128], index: 1, kind: input, shape index: {}]   ;;  %s905_s2 = inlined_call_operand.hbm [shape: f32[2,1,8,128], index: 2, kind: output, shape index: {0}]   ;;  %s906_s3 = inlined_call_operand.hbm [shape: f32[2,1,8,128], index: 3, kind: output, shape index: {1}]  }
   0x1   :  { %11 = vsyncpa [#allocation3 + $0x1], 0 }
   0x2   :  { %12 = vsyncpa [#allocation4], 0 }
   0x3   :  { %14 = vsyncpa [#allocation4 + $0x1], 0 }
   0x4   :  { %15 = vsyncpa [#allocation7], 0 }
   0x5   :  { %17 = vsyncpa [#allocation7 + $0x1], 0  ;;  %s686_s12 = smov 0   ;;  %s688_s13 = smov 0  }
   0x6   :  { %s690_s14 = smov 0   ;;  %s692_s15 = smov 0  }
   0x7   :  { %s694_s16 = smov 0   ;;  %s696_s17 = smov 0  }
   0x8 LB: > { %s434_s18 = sadd.s32 4294967295, %s660_s17   ;;  %s435_s19 = sadd.s32 4294967294, %s660_s17   ;;  %s660_s17 = sphi %s696_s17, %s23_s17   ;;  %s656_s16 = sphi %s694_s16, %s922_s16   ;;  %s652_s15 = sphi %s692_s15, %s921_s15   ;;  %s648_s14 = sphi %s690_s14, %s920_s14   ;;  %s644_s13 = sphi %s688_s13, %s919_s13   ;;  %s640_s12 = sphi %s686_s12, %s918_s12  }
   0x9   : > { %s42_s20 = sadd.s32 1, %s656_s16  ;;  %s53_s21 = sadd.s32 1, %s648_s14 }
   0xa   : > { %p44_p0 = scmp.ge.s32.totalorder %s42_s20, 2  ;;  %p60_p1 = scmp.ne.s32.totalorder %s648_s14, %s644_s13 }
   0xb   : > { %p61_p2 = scmp.eq.s32.totalorder %s660_s17, 0  ;;  %p66_p3 = scmp.ne.s32.totalorder %s644_s13, %s640_s12 }
   0xc   : > { %s924_s20 = smov (%p44_p0, %s42_s20), 0  ;;  %p67_p5 = scmp.eq.s32.totalorder %s434_s18, 0 }
   0xd   : > { %p727_p4 = por %p61_p2, %p60_p1  ;;  %s48_s23 = ssub.s32 %s656_s16, %s924_s20 }
   0xe   : > { %p122_p6 = scmp.eq.s32.totalorder %s434_s18, 1  ;;  %p51_p7 = scmp.eq.s32.totalorder %s48_s23, 0 }
   0xf   : > { %p733_p8 = por %p67_p5, %p66_p3  ;;  %p128_p10 = scmp.eq.s32.totalorder %s435_s19, 1 }
  0x10   : > { %p737_p9 = por %p122_p6, %p60_p1  ;;  %p465_p13 = scmp.lt.s32.totalorder %s660_s17, 2 }
  0x11   : > { %s742_s26 = scalar_select %p51_p7, %s648_s14, %s53_s21  }
  0x12   : > { %s910_s25 = scalar_select %p737_p9, 1, 0 }
  0x13   : > { %p744_p11 = por %p128_p10, %p66_p3  ;;  %s176_s28 = sand.u32 1, %s648_s14  }
  0x14   : > { %s438_s29 = sshll.u32 %s656_s16, 4  ;;  %s179_s30 = scalar_lea.vmem [#allocation2], %s176_s28 }
  0x15   : > { %s911_s27 = scalar_select %p744_p11, 1, 0 }
  0x16   : > { %s188_s4 = sshll.u32 %s179_s30, 4  ;;  %s755_s7 = scalar_lea.hbm %s903_s0, %s438_s29  ;;  %s757_s4 = int_to_ptr.vmem [resolvable:$true] %s188_s4 }
  0x17   : > { %p761_p0 = pnand %p465_p13, %p727_p4  ;;  %s177_s9 = scalar_lea.sflag [#allocation3], %s176_s28 }
  0x18   : > { %s516_s10 = scalar_lea.hbm %s755_s7, 16  ;;  %s521_s19 = scalar_lea.hbm %s903_s0, 32 }
  0x19   : > { %p517_p3 = scmp.ne.s32.totalorder %s755_s7, %s516_s10  ;;  %p518_p5 = pneg %p761_p0 }
  0x1a   : > { %p522_p4 = scmp.lt.u32.totalorder %s755_s7, %s903_s0  ;;  %p523_p10 = scmp.lt.u32.totalorder %s521_s19, %s516_s10 }
  0x1b   : > { %p519_p6 = pnand %p518_p5, %p517_p3  ;;  %p525_p12 = scmp.lt.u32.totalorder %s516_s10, %s755_s7 }
  0x1c   : > { %p524_p13 = por %p523_p10, %p522_p4 }
  0x1d   : > { %p520_p7 = pneg %p519_p6 }
  0x1e   : > { %p526_p1 = por %p525_p12, %p524_p13 }
  0x20   : > { %p527_p2 = pnand %p526_p1, %p520_p7 }
  0x22   : > { %530 = shalt.err (!%p527_p2)
}
  0x23   : > { %s531_s23 = scalar_lea.vmem %s757_s4, 16  ;;  %s662_s28 = smov [#allocation2]  }
  0x24   : > { %p532_p3 = scmp.ne.s32.totalorder %s757_s4, %s531_s23  ;;  %s536_s29 = sshll.u32 %s662_s28, 4  ;;  %s537_s29 = int_to_ptr.vmem [resolvable:$false] %s536_s29 }
  0x25   : > { %s538_s30 = scalar_lea.vmem %s537_s29, 32  ;;  %p539_p9 = scmp.lt.s32.totalorder %s757_s4, %s537_s29 }
  0x26   : > { %p534_p6 = pnand %p532_p3, %p518_p5  ;;  %p540_p4 = scmp.lt.s32.totalorder %s538_s30, %s531_s23 }
  0x28   : > { %p535_p11 = pneg %p534_p6  ;;  %p541_p10 = por %p540_p4, %p539_p9 }
  0x2a   : > { %p542_p12 = pnand %p541_p10, %p535_p11 }
  0x2c   : > { %545 = shalt.err (!%p542_p12)
}
  0x2d   : > { %457 = dma.hbm_to_vmem [thread:$0]  (!%p761_p0), %s755_s7, 16, %s757_s4, %s177_s9  }
  0x2e   : > { %p913_p1 = scmp.lt.s32.totalorder %s660_s17, 3  ;;  %p914_p2 = scmp.ge.s32.totalorder %s660_s17, 1 }
  0x30   : > { %p205_p5 = pnand %p914_p2, %p913_p1 }
  0x31   : > { %s797_s5 = sand.u32 (!%p205_p5), 1, %s644_s13  }
  0x32   : > { %208 = sbr.rel (%p205_p5) target bundleno = 110 (0x6e), region = 28  ;;  %s211_s6 = scalar_lea.sflag (!%p205_p5), [#allocation3], %s797_s5 }
  0x33   : > { %s213_s10 = scalar_lea.vmem (!%p205_p5), [#allocation2], %s797_s5 }
  0x39   : > { %627 = dma.done.wait (%p733_p8), %s211_s6, 16  }
  0x3a   : > { %629 = vsyncadd (%p733_p8), %s211_s6, 4294967280  ;;  %s440_s4 = sshll.u32 %s797_s5, 3  ;;  %p249_p9 = scmp.lt.s32.totalorder %s652_s15, 1  ;;  %v663_v0 = vmov 0.0   ;;  %v262_v1 = vld [vmem:[%s213_s10] sm:$0x1] }
  0x3b   : > { %s239_s7 = scalar_lea.vmem [#allocation5], %s440_s4  ;;  %s807_s8 = scalar_lea.vmem [#allocation6], %s440_s4  ;;  %v266_v3 = vand.u32 2147483647, %v262_v1 }
  0x3c   : > { %260 = vst [vmem:[%s239_s7] sm:$0xff] %v663_v0  ;;  %261 = vst [vmem:[%s807_s8] sm:$0xff] %v663_v0  ;;  %s250_s9 = scalar_select %p249_p9, %s652_s15, 1 }
  0x3d   : > { %s294_s11 = sshll.u32 %s239_s7, 4  ;;  %s444_s21 = sshll.u32 %s652_s15, 7  ;;  %s815_s11 = int_to_ptr.vmem [resolvable:$true] %s294_s11 }
  0x3e   : > { %s254_s19 = scalar_lea.vmem %s904_s1, %s250_s9  ;;  %s308_s22 = sshll.u32 %s807_s8, 4  ;;  %s826_s22 = int_to_ptr.vmem [resolvable:$true] %s308_s22 }
  0x3f   : > { %v263_v2 = vld [vmem:[%s254_s19] sm:$0x1]  ;;  %s823_s29 = scalar_lea.hbm %s905_s2, %s444_s21  ;;  %s275_s30 = scalar_lea.sflag [#allocation4], %s797_s5 }
  0x40   : > { %v264_v4 = vand.u32 2147483647, %v263_v2  ;;  %s546_s6 = scalar_lea.vmem %s815_s11, 128  ;;  %p915_p11 = scmp.ne.s32.totalorder %s910_s25, 0 }
  0x41   : > { %p547_p8 = scmp.ne.s32.totalorder %s815_s11, %s546_s6  ;;  %s664_s10 = smov [#allocation5]  }
  0x42   : > { %v265_v7 = vsub.f32 0.0, %v264_v4  ;;  %s550_s4 = sshll.u32 %s664_s10, 4  ;;  %s551_s4 = int_to_ptr.vmem [resolvable:$false] %s550_s4 }
  0x43   : > { %v268_v5 = vld [vmem:[%s239_s7] sm:$0x1]  ;;  %v271_v8 = vld [vmem:[%s807_s8] sm:$0x1]  ;;  %p548_p0 = pnand %p547_p8, %p915_p11  ;;  %s552_s9 = scalar_lea.vmem %s551_s4, 256 }
  0x44   : > { %v269_v6 = vadd.f32 %v268_v5, %v266_v3  ;;  %v267_v9 = vmul.f32 %v265_v7, %v262_v1  ;;  %p553_p13 = scmp.lt.s32.totalorder %s815_s11, %s551_s4  ;;  %p554_p3 = scmp.lt.s32.totalorder %s552_s9, %s546_s6 }
  0x45   : > { %p549_p7 = pneg %p548_p0 }
  0x46   : > { %270 = vst [vmem:[%s239_s7] sm:$0x1] %v269_v6  ;;  %p555_p6 = por %p554_p3, %p553_p13 }
  0x48   : > { %p556_p4 = pnand %p555_p6, %p549_p7 }
  0x4a   : > { %559 = shalt.err (!%p556_p4)
}
  0x4b   : > { %s560_s7 = scalar_lea.hbm %s823_s29, 128  ;;  %s564_s19 = scalar_lea.hbm %s905_s2, 256 }
  0x4c   : > { %p561_p10 = scmp.ne.s32.totalorder %s823_s29, %s560_s7  ;;  %p565_p2 = scmp.lt.u32.totalorder %s823_s29, %s905_s2 }
  0x4d   : > { %p566_p5 = scmp.lt.u32.totalorder %s564_s19, %s560_s7  ;;  %p568_p8 = scmp.lt.u32.totalorder %s560_s7, %s823_s29 }
  0x4e   : > { %p562_p12 = pnand %p561_p10, %p915_p11 }
  0x4f   : > { %p567_p9 = por %p566_p5, %p565_p2 }
  0x50   : > { %p563_p1 = pneg %p562_p12 }
  0x51   : > { %p569_p0 = por %p568_p8, %p567_p9 }
  0x53   : > { %p570_p7 = pnand %p569_p0, %p563_p1 }
  0x55   : > { %573 = shalt.err (!%p570_p7)
}
  0x56   : > { %450 = dma.vmem_to_hbm [thread:$0]  (%p915_p11), %s815_s11, 128, %s823_s29, %s275_s30   ;;  %v272_v10 = vadd.f32 %v271_v8, %v267_v9 }
  0x57   : > { %s855_s4 = scalar_lea.hbm %s906_s3, %s444_s21  ;;  %s280_s9 = scalar_lea.sflag [#allocation7], %s797_s5 }
  0x58   : > { %273 = vst [vmem:[%s807_s8] sm:$0x1] %v272_v10  ;;  %s574_s7 = scalar_lea.vmem %s826_s22, 128  ;;  %s665_s24 = smov [#allocation6]  }
  0x59   : > { %p575_p13 = scmp.ne.s32.totalorder %s826_s22, %s574_s7  ;;  %s578_s18 = sshll.u32 %s665_s24, 4  ;;  %s579_s18 = int_to_ptr.vmem [resolvable:$false] %s578_s18 }
  0x5a   : > { %s580_s19 = scalar_lea.vmem %s579_s18, 256  ;;  %p581_p4 = scmp.lt.s32.totalorder %s826_s22, %s579_s18 }
  0x5b   : > { %p576_p3 = pnand %p575_p13, %p915_p11  ;;  %p582_p10 = scmp.lt.s32.totalorder %s580_s19, %s574_s7 }
  0x5d   : > { %p577_p6 = pneg %p576_p3  ;;  %p583_p12 = por %p582_p10, %p581_p4 }
  0x5f   : > { %p584_p1 = pnand %p583_p12, %p577_p6 }
  0x61   : > { %587 = shalt.err (!%p584_p1)
}
  0x62   : > { %s588_s15 = scalar_lea.hbm %s855_s4, 128  ;;  %s592_s11 = scalar_lea.hbm %s906_s3, 256 }
  0x63   : > { %p589_p2 = scmp.ne.s32.totalorder %s855_s4, %s588_s15  ;;  %p593_p8 = scmp.lt.u32.totalorder %s855_s4, %s906_s3 }
  0x64   : > { %p594_p0 = scmp.lt.u32.totalorder %s592_s11, %s588_s15  ;;  %p596_p13 = scmp.lt.u32.totalorder %s588_s15, %s855_s4 }
  0x65   : > { %p590_p5 = pnand %p589_p2, %p915_p11 }
  0x66   : > { %p595_p7 = por %p594_p0, %p593_p8 }
  0x67   : > { %p591_p9 = pneg %p590_p5 }
  0x68   : > { %p597_p3 = por %p596_p13, %p595_p7 }
  0x6a   : > { %p598_p6 = pnand %p597_p3, %p591_p9 }
  0x6c   : > { %601 = shalt.err (!%p598_p6)
}
  0x6d   : > { %451 = dma.vmem_to_hbm [thread:$0]  (%p915_p11), %s826_s22, 128, %s855_s4, %s280_s9  }
  0x6e PF: > { %s320_s30 = sand.u32 1, %s640_s12   ;;  %p916_p4 = scmp.ne.s32.totalorder %s911_s27, 0 }
  0x6f   : > { %p917_p10 = scmp.ge.s32.totalorder %s660_s17, 2  ;;  %s321_s23 = scalar_lea.sflag [#allocation4], %s320_s30 }
  0x71   : > { %p459_p12 = pnand %p917_p10, %p916_p4 }
  0x73   : > { %631 = dma.done.wait (!%p459_p12), %s321_s23, 128  }
  0x74   : > { %633 = vsyncadd (!%p459_p12), %s321_s23, 4294967168  ;;  %s330_s28 = scalar_lea.sflag [#allocation7], %s320_s30 }
  0x75   : > { %635 = dma.done.wait (!%p459_p12), %s330_s28, 128  }
  0x76   : > { %637 = vsyncadd (!%p459_p12), %s330_s28, 4294967168  ;;  %s23_s17 = sadd.s32 1, %s660_s17   ;;  %s918_s12 = smov %s644_s13 }
  0x77   : > { %p20_p1 = scmp.ge.s32.totalorder %s23_s17, 4   ;;  %s919_s13 = smov %s648_s14 }
  0x78   : > { %s920_s14 = smov %s742_s26  ;;  %s921_s15 = smov %s656_s16 }
  0x79   : > { %s922_s16 = smov %s924_s20  ;;  %22 = sbr.rel (!%p20_p1) target bundleno = 8 (0x8), region = 97 }
  0x80   :  { %335 = vsyncpa [#allocation3], 1 }
  0x81   :  { %337 = vsyncpa [#allocation3 + $0x1], 1 }
  0x82   :  { %338 = vsyncpa [#allocation4], 1 }
  0x83   :  { %340 = vsyncpa [#allocation4 + $0x1], 1 }
  0x84   :  { %341 = vsyncpa [#allocation7], 1 }
  0x85   :  { %343 = vsyncpa [#allocation7 + $0x1], 1 }

</bundles_post_ra>
